<compile_context>
chip_gen: v7x
topology: tpu7x:2x2x1
jax: 0.10.0
libtpu: 0.0.40
codegen_flags: <defaults>
</compile_context>

<pallas_src>
import jax
import jax.numpy as jnp
from jax.experimental import pallas as pl
from jax.experimental.pallas import tpu as pltpu

D_MLP = 256
SAE_DIM = 256


def sae_kernel(h_ref, w_enc_t_ref, b_eff_ref, w_dec_t_ref, b_dec_ref,
               out_ref, mid_ref):
    # h_ref: (tm, d_mlp); weights are full resident tiles; biases are (1, N) f32 rows.
    # Encoder: ReLU(h @ W_enc.T + b_eff) with f32 MXU accumulation.
    z = jnp.dot(h_ref[...], w_enc_t_ref[...],
                preferred_element_type=jnp.float32) + b_eff_ref[...]
    z = jnp.maximum(z, 0.0)                                        # ReLU
    mid_ref[...] = z.astype(mid_ref.dtype)                         # (tm, sae_dim)
    # Decoder: z @ W_dec.T + b_dec (operands in weight dtype, f32 accumulation).
    y = jnp.dot(z.astype(w_dec_t_ref.dtype), w_dec_t_ref[...],
                preferred_element_type=jnp.float32) + b_dec_ref[...]
    out_ref[...] = y.astype(out_ref.dtype)                         # (tm, d_mlp)


def sae_forward(h, w_enc_t, w_dec_t, b_enc, b_dec, *, tm=512, mid_dtype=None):
    """SAE forward.

    Args:
      h: (B, d_mlp) activations.
      w_enc_t: (d_mlp, sae_dim) pre-transposed encoder weight (W_enc.T).
      w_dec_t: (sae_dim, d_mlp) pre-transposed decoder weight (W_dec.T).
      b_enc: (sae_dim,), b_dec: (d_mlp,).
      tm: batch tile (rows per grid step); clamped / aligned automatically.
      mid_dtype: dtype of the intermediate output (default: h.dtype).

    Returns:
      (reconstruction (B, d_mlp), intermediate (B, sae_dim)).
    """
    B, d_mlp = h.shape
    sae_dim = w_enc_t.shape[1]
    mid_dtype = h.dtype if mid_dtype is None else mid_dtype

    # Fold b_dec into the encoder bias once, at trace time (outside the kernel):
    #   (h - b_dec) @ W_enc.T + b_enc == h @ W_enc.T + (b_enc - b_dec @ W_enc.T)
    b_eff = (b_enc.astype(jnp.float32)
             - jnp.dot(b_dec.astype(jnp.float32), w_enc_t.astype(jnp.float32)))
    b_eff_2d = b_eff.reshape(1, sae_dim)
    b_dec_2d = b_dec.astype(jnp.float32).reshape(1, d_mlp)

    # Choose an effective tile: multiple of 8 sublanes, no larger than the
    # (8-aligned) batch, and pad the batch so the grid divides evenly.
    b_aligned = max(8, ((B + 7) // 8) * 8)
    tm_eff = max(8, (min(tm, b_aligned) // 8) * 8)
    b_pad = pl.cdiv(B, tm_eff) * tm_eff
    h_padded = jnp.pad(h, ((0, b_pad - B), (0, 0))) if b_pad != B else h

    itemsize = jnp.dtype(h.dtype).itemsize
    mid_itemsize = jnp.dtype(mid_dtype).itemsize
    cost = pl.CostEstimate(
        flops=4 * b_pad * d_mlp * sae_dim,           # two (M,K)x(K,N) matmuls
        transcendentals=0,
        bytes_accessed=(b_pad * d_mlp * 2 * itemsize          # h read + out write
                        + b_pad * sae_dim * mid_itemsize      # mid write
                        + (w_enc_t.size + w_dec_t.size) * jnp.dtype(w_enc_t.dtype).itemsize
                        + (sae_dim + d_mlp) * 4),
    )

    out, mid = pl.pallas_call(
        sae_kernel,
        out_shape=(
            jax.ShapeDtypeStruct((b_pad, d_mlp), h.dtype),
            jax.ShapeDtypeStruct((b_pad, sae_dim), mid_dtype),
        ),
        grid_spec=pltpu.PrefetchScalarGridSpec(
            num_scalar_prefetch=0,
            grid=(b_pad // tm_eff,),
            in_specs=[
                pl.BlockSpec((tm_eff, d_mlp), lambda i: (i, 0)),    # h tile
                pl.BlockSpec((d_mlp, sae_dim), lambda i: (0, 0)),   # W_enc.T (resident)
                pl.BlockSpec((1, sae_dim), lambda i: (0, 0)),       # b_eff
                pl.BlockSpec((sae_dim, d_mlp), lambda i: (0, 0)),   # W_dec.T (resident)
                pl.BlockSpec((1, d_mlp), lambda i: (0, 0)),         # b_dec
            ],
            out_specs=[
                pl.BlockSpec((tm_eff, d_mlp), lambda i: (i, 0)),    # reconstruction
                pl.BlockSpec((tm_eff, sae_dim), lambda i: (i, 0)),  # intermediate
            ],
        ),
        compiler_params=pltpu.CompilerParams(
            dimension_semantics=("parallel",)),                     # megacore on v7x
        cost_estimate=cost,
    )(h_padded, w_enc_t, b_eff_2d, w_dec_t, b_dec_2d)

    if b_pad != B:
        out = out[:B]
        mid = mid[:B]
    return out, mid


def init_params(key, d_mlp=D_MLP, sae_dim=SAE_DIM, dtype=jnp.float32):
    """Deterministic xavier_uniform init with gain=calculate_gain('relu')=sqrt(2).

    Returns weights in the canonical pre-transposed layout used by the kernel
    (W_enc_T: (d_mlp, sae_dim), W_dec_T: (sae_dim, d_mlp)), plus nonzero biases
    so the bias-folding path is exercised.
    """
    k_enc, k_dec, k_be, k_bd = jax.random.split(key, 4)
    gain = jnp.sqrt(2.0)

    def xavier(k, shape):
        fan_out, fan_in = shape
        bound = gain * jnp.sqrt(6.0 / (fan_in + fan_out))
        return jax.random.uniform(k, shape, dtype, minval=-bound, maxval=bound)

    W_enc = xavier(k_enc, (sae_dim, d_mlp))
    W_dec = xavier(k_dec, (d_mlp, sae_dim))
    b_enc = 0.1 * jax.random.normal(k_be, (sae_dim,), dtype)
    b_dec = 0.1 * jax.random.normal(k_bd, (d_mlp,), dtype)
    # Pre-transpose once; these are the canonical params passed to sae_forward.
    return W_enc.T, W_dec.T, b_enc, b_dec


def sae_forward_ref(h, w_enc_t, w_dec_t, b_enc, b_dec):
    mid = jax.nn.relu((h - b_dec) @ w_enc_t + b_enc)
    return mid @ w_dec_t + b_dec, mid


if __name__ == "__main__":
    key = jax.random.PRNGKey(0)
    k_param, k_h1, k_h2 = jax.random.split(key, 3)

    w_enc_t, w_dec_t, b_enc, b_dec = init_params(k_param)

    # Small case (matches the module's natural shapes).
    B1 = 8
    h1 = jax.random.normal(k_h1, (B1, D_MLP), jnp.float32)
    out1, mid1 = sae_forward(h1, w_enc_t, w_dec_t, b_enc, b_dec)
    out1 = jax.block_until_ready(out1)
    mid1 = jax.block_until_ready(mid1)
    out1_ref, mid1_ref = sae_forward_ref(h1, w_enc_t, w_dec_t, b_enc, b_dec)
    assert out1.shape == (B1, D_MLP) and mid1.shape == (B1, SAE_DIM)
    assert jnp.allclose(out1, out1_ref, atol=2e-4, rtol=2e-4)
    assert jnp.allclose(mid1, mid1_ref, atol=2e-4, rtol=2e-4)

    # Non-multiple batch: exercises cdiv grid + padding and a larger tile.
    B2 = 300
    h2 = jax.random.normal(k_h2, (B2, D_MLP), jnp.float32)
    out2, mid2 = sae_forward(h2, w_enc_t, w_dec_t, b_enc, b_dec, tm=512)
    out2 = jax.block_until_ready(out2)
    mid2 = jax.block_until_ready(mid2)
    out2_ref, mid2_ref = sae_forward_ref(h2, w_enc_t, w_dec_t, b_enc, b_dec)
    assert out2.shape == (B2, D_MLP) and mid2.shape == (B2, SAE_DIM)
    assert jnp.allclose(out2, out2_ref, atol=2e-4, rtol=2e-4)
    assert jnp.allclose(mid2, mid2_ref, atol=2e-4, rtol=2e-4)

    print("KERNEL_OK")
</pallas_src>

<mosaic_0001>
module attributes {stable_mosaic.version = 11 : i64} {
  func.func @sae_kernel(%arg0: i32, %arg1: memref<8x256xf32, #tpu.memory_space<vmem>>, %arg2: memref<256x256xf32, #tpu.memory_space<vmem>>, %arg3: memref<1x256xf32, #tpu.memory_space<vmem>>, %arg4: memref<256x256xf32, #tpu.memory_space<vmem>>, %arg5: memref<1x256xf32, #tpu.memory_space<vmem>>, %arg6: memref<8x256xf32, #tpu.memory_space<vmem>>, %arg7: memref<8x256xf32, #tpu.memory_space<vmem>>) attributes {dimension_semantics = [#tpu.dimension_semantics<parallel>], iteration_bounds = array<i64: 1>, scalar_prefetch = 0 : i64, scratch_operands = 0 : i64, tpu.core_type = #tpu.core_type<tc>, window_params = [{transform_indices = @transform_0, window_bounds = array<i64: 8, 256>}, {pipeline_mode = #tpu.pipeline_mode<synchronous>, transform_indices = @transform_1, window_bounds = array<i64: 256, 256>}, {pipeline_mode = #tpu.pipeline_mode<synchronous>, transform_indices = @transform_2, window_bounds = array<i64: 1, 256>}, {pipeline_mode = #tpu.pipeline_mode<synchronous>, transform_indices = @transform_3, window_bounds = array<i64: 256, 256>}, {pipeline_mode = #tpu.pipeline_mode<synchronous>, transform_indices = @transform_4, window_bounds = array<i64: 1, 256>}, {transform_indices = @transform_5, window_bounds = array<i64: 8, 256>}, {transform_indices = @transform_6, window_bounds = array<i64: 8, 256>}]} {
    %c0 = arith.constant 0 : index
    %c0_0 = arith.constant 0 : index
    %0 = vector.load %arg1[%c0, %c0_0] : memref<8x256xf32, #tpu.memory_space<vmem>>, vector<8x256xf32>
    %c0_1 = arith.constant 0 : index
    %c0_2 = arith.constant 0 : index
    %1 = vector.load %arg2[%c0_1, %c0_2] : memref<256x256xf32, #tpu.memory_space<vmem>>, vector<256x256xf32>
    %cst = arith.constant dense<0.000000e+00> : vector<8x256xf32>
    %2 = tpu.matmul %0, %1, %cst {dimension_numbers = #tpu.dot_dimension_numbers<[1], [0], [0], [1], [0, 0, 1, 1], [], []>} : vector<8x256xf32>, vector<256x256xf32>, vector<8x256xf32> -> vector<8x256xf32>
    %c0_3 = arith.constant 0 : index
    %c0_4 = arith.constant 0 : index
    %3 = vector.load %arg3[%c0_3, %c0_4] : memref<1x256xf32, #tpu.memory_space<vmem>>, vector<1x256xf32>
    %4 = vector.broadcast %3 : vector<1x256xf32> to vector<8x256xf32>
    %5 = arith.addf %2, %4 : vector<8x256xf32>
    %cst_5 = arith.constant 0.000000e+00 : f32
    %6 = vector.broadcast %cst_5 : f32 to vector<8x256xf32>
    %7 = arith.maximumf %5, %6 : vector<8x256xf32>
    %c0_6 = arith.constant 0 : index
    %c0_7 = arith.constant 0 : index
    %8 = vector.load %arg7[%c0_6, %c0_7] : memref<8x256xf32, #tpu.memory_space<vmem>>, vector<8x256xf32>
    tpu.vector_store %arg7[%c0_6, %c0_7], %7 {strides = array<i32>} : memref<8x256xf32, #tpu.memory_space<vmem>>, vector<8x256xf32>,
    %c0_8 = arith.constant 0 : index
    %c0_9 = arith.constant 0 : index
    %9 = vector.load %arg4[%c0_8, %c0_9] : memref<256x256xf32, #tpu.memory_space<vmem>>, vector<256x256xf32>
    %cst_10 = arith.constant dense<0.000000e+00> : vector<8x256xf32>
    %10 = tpu.matmul %7, %9, %cst_10 {dimension_numbers = #tpu.dot_dimension_numbers<[1], [0], [0], [1], [0, 0, 1, 1], [], []>} : vector<8x256xf32>, vector<256x256xf32>, vector<8x256xf32> -> vector<8x256xf32>
    %c0_11 = arith.constant 0 : index
    %c0_12 = arith.constant 0 : index
    %11 = vector.load %arg5[%c0_11, %c0_12] : memref<1x256xf32, #tpu.memory_space<vmem>>, vector<1x256xf32>
    %12 = vector.broadcast %11 : vector<1x256xf32> to vector<8x256xf32>
    %13 = arith.addf %10, %12 : vector<8x256xf32>
    %c0_13 = arith.constant 0 : index
    %c0_14 = arith.constant 0 : index
    %14 = vector.load %arg6[%c0_13, %c0_14] : memref<8x256xf32, #tpu.memory_space<vmem>>, vector<8x256xf32>
    tpu.vector_store %arg6[%c0_13, %c0_14], %13 {strides = array<i32>} : memref<8x256xf32, #tpu.memory_space<vmem>>, vector<8x256xf32>,
    return
  }
  func.func @transform_0(%arg0: i32) -> (i32, i32) {
    %c0_i32 = arith.constant 0 : i32
    %c0_i32_0 = arith.constant 0 : i32
    return %arg0, %c0_i32 : i32, i32
  }
  func.func @transform_1(%arg0: i32) -> (i32, i32) {
    %c0_i32 = arith.constant 0 : i32
    %c0_i32_0 = arith.constant 0 : i32
    %c0_i32_1 = arith.constant 0 : i32
    return %c0_i32, %c0_i32_0 : i32, i32
  }
  func.func @transform_2(%arg0: i32) -> (i32, i32) {
    %c0_i32 = arith.constant 0 : i32
    %c0_i32_0 = arith.constant 0 : i32
    %c0_i32_1 = arith.constant 0 : i32
    return %c0_i32, %c0_i32_0 : i32, i32
  }
  func.func @transform_3(%arg0: i32) -> (i32, i32) {
    %c0_i32 = arith.constant 0 : i32
    %c0_i32_0 = arith.constant 0 : i32
    %c0_i32_1 = arith.constant 0 : i32
    return %c0_i32, %c0_i32_0 : i32, i32
  }
  func.func @transform_4(%arg0: i32) -> (i32, i32) {
    %c0_i32 = arith.constant 0 : i32
    %c0_i32_0 = arith.constant 0 : i32
    %c0_i32_1 = arith.constant 0 : i32
    return %c0_i32, %c0_i32_0 : i32, i32
  }
  func.func @transform_5(%arg0: i32) -> (i32, i32) {
    %c0_i32 = arith.constant 0 : i32
    %c0_i32_0 = arith.constant 0 : i32
    return %arg0, %c0_i32 : i32, i32
  }
  func.func @transform_6(%arg0: i32) -> (i32, i32) {
    %c0_i32 = arith.constant 0 : i32
    %c0_i32_0 = arith.constant 0 : i32
    return %arg0, %c0_i32 : i32, i32
  }
}

</mosaic_0001>

<bundles_post_ra>
// kernel: tpu_custom_call.1
= control target key start
LH: loop header
LB: loop body
LE: loop exit
PB: predicated region body
PF: predicated region fallthrough
CT: control target
= control target key end

     0   :  { %12 = vsyncpa [#allocation3], 0  ;;  %s762_s0 = inlined_call_operand.hbm [shape: f32[8,256], index: 0, kind: input, shape index: {}]   ;;  %s763_s1 = inlined_call_operand.hbm [shape: f32[256,256], index: 1, kind: input, shape index: {}]   ;;  %s764_s2 = inlined_call_operand.vmem [shape: f32[1,256], index: 2, kind: input, shape index: {}]   ;;  %s765_s3 = inlined_call_operand.hbm [shape: f32[256,256], index: 3, kind: input, shape index: {}]   ;;  %s766_s4 = inlined_call_operand.vmem [shape: f32[1,256], index: 4, kind: input, shape index: {}]   ;;  %s767_s5 = inlined_call_operand.hbm [shape: f32[8,256], index: 5, kind: output, shape index: {0}]   ;;  %s768_s6 = inlined_call_operand.hbm [shape: f32[8,256], index: 6, kind: output, shape index: {1}]  }
   0x1   :  { %13 = vsyncpa [#allocation6], 0 }
   0x2   :  { %14 = vsyncpa [#allocation4], 0 }
   0x3   :  { %15 = vsyncpa [#allocation10], 0  ;;  %s648_s21 = smov [#allocation5]   ;;  %s530_s25 = scalar_lea.hbm %s763_s1, 8192 }
   0x4   :  { %s31_s22 = sshll.u32 %s648_s21, 4  ;;  %p531_p0 = scmp.ne.s32.totalorder %s763_s1, %s530_s25  ;;  %s32_s22 = int_to_ptr.vmem [resolvable:$true] %s31_s22 }
   0x5   :  { %p534_p1 = scmp.lt.u32.totalorder %s530_s25, %s763_s1 }
   0x7   :  { %p536_p2 = pnand %p534_p1, %p531_p0 }
   0x9   :  { %539 = shalt.err (!%p536_p2)
}
   0xa   :  { %s540_s30 = scalar_lea.vmem %s32_s22, 8192  ;;  %p545_p4 = scmp.lt.s32.totalorder %s32_s22, %s32_s22 }
   0xb   :  { %p541_p3 = scmp.ne.s32.totalorder %s32_s22, %s540_s30  ;;  %p546_p5 = scmp.lt.s32.totalorder %s540_s30, %s540_s30 }
   0xd   :  { %p547_p6 = por %p546_p5, %p545_p4 }
   0xf   :  { %p548_p7 = pnand %p547_p6, %p541_p3 }
  0x11   :  { %551 = shalt.err (!%p548_p7)
}
  0x12   :  { %s649_s7 = smov 256   ;;  %s650_s8 = smov 16  }
  0x13   :  { %37 = dma.hbm_to_vmem [thread:$0]  %s763_s1, 8192, %s32_s22, [#allocation6], %s649_s7, %s649_s7, %s650_s8  }
  0x14   :  { %s651_s11 = smov [#allocation2]   ;;  %s652_s13 = smov [#allocation7]  }
  0x15   :  { %s22_s12 = sshll.u32 %s651_s11, 4  ;;  %s45_s14 = sshll.u32 %s652_s13, 4  ;;  %s23_s12 = int_to_ptr.vmem [resolvable:$true] %s22_s12  ;;  %s46_s14 = int_to_ptr.vmem [resolvable:$true] %s45_s14 }
  0x16   :  { %s552_s17 = scalar_lea.hbm %s762_s0, 256 }
  0x17   :  { %p553_p8 = scmp.ne.s32.totalorder %s762_s0, %s552_s17  ;;  %p556_p9 = scmp.lt.u32.totalorder %s552_s17, %s762_s0 }
  0x19   :  { %p558_p10 = pnand %p556_p9, %p553_p8 }
  0x1b   :  { %561 = shalt.err (!%p558_p10)
}
  0x1c   :  { %s562_s1 = scalar_lea.vmem %s23_s12, 256  ;;  %p567_p12 = scmp.lt.s32.totalorder %s23_s12, %s23_s12 }
  0x1d   :  { %p563_p11 = scmp.ne.s32.totalorder %s23_s12, %s562_s1  ;;  %p568_p13 = scmp.lt.s32.totalorder %s562_s1, %s562_s1 }
  0x1f   :  { %p569_p0 = por %p568_p13, %p567_p12 }
  0x21   :  { %p570_p1 = pnand %p569_p0, %p563_p11 }
  0x23   :  { %573 = shalt.err (!%p570_p1)
}
  0x24   :  { %25 = dma.hbm_to_vmem [thread:$0]  %s762_s0, 256, %s23_s12, [#allocation3]  }
  0x25   :  { %s574_s26 = scalar_lea.hbm %s765_s3, 8192 }
  0x26   :  { %p575_p2 = scmp.ne.s32.totalorder %s765_s3, %s574_s26  ;;  %p578_p3 = scmp.lt.u32.totalorder %s574_s26, %s765_s3 }
  0x28   :  { %p580_p4 = pnand %p578_p3, %p575_p2 }
  0x2a   :  { %583 = shalt.err (!%p580_p4)
}
  0x2b   :  { %s584_s9 = scalar_lea.vmem %s46_s14, 8192  ;;  %p589_p6 = scmp.lt.s32.totalorder %s46_s14, %s46_s14 }
  0x2c   :  { %p585_p5 = scmp.ne.s32.totalorder %s46_s14, %s584_s9  ;;  %p590_p7 = scmp.lt.s32.totalorder %s584_s9, %s584_s9 }
  0x2e   :  { %p591_p8 = por %p590_p7, %p589_p6 }
  0x30   :  { %p592_p9 = pnand %p591_p8, %p585_p5 }
  0x32   :  { %595 = shalt.err (!%p592_p9)
}
  0x33   :  { %51 = dma.hbm_to_vmem [thread:$0]  %s765_s3, 8192, %s46_s14, [#allocation6], %s649_s7, %s649_s7, %s650_s8  }
  0x34   :  { %640 = dma.done.wait [#allocation3], 256  }
  0x35   :  { %641 = vsyncadd [#allocation3], 4294967040 }
  0x36   :  { %642 = dma.done.wait [#allocation6], 16384  }
  0x37   :  { %643 = vsyncadd [#allocation6], 4294950912  ;;  %v66_v0 = vld [vmem:[#allocation5 + $0x8] sm:$0xff]  ;;  %v68_v1 = vld [vmem:[#allocation5 + $0x18] sm:$0xff]  ;;  %s653_s8 = smov [#allocation9]  }
  0x38   :  { %v65_v2 = vld [vmem:[#allocation5] sm:$0xff]  ;;  %v395_v3 = vpack.c.bf16 %v68_v1, %v66_v0  ;;  %v67_v4 = vld [vmem:[#allocation5 + $0x10] sm:$0xff]  ;;  %v70_v5 = vld [vmem:[#allocation5 + $0x28] sm:$0xff]  ;;  %s381_s11 = sshll.u32 %s653_s8, 4  ;;  %s382_s11 = int_to_ptr.vmem [resolvable:$true] %s381_s11 }
  0x39   :  { %v72_v6 = vld [vmem:[#allocation5 + $0x38] sm:$0xff]  ;;  %v397_v7 = vpack.c.bf16 %v67_v4, %v65_v2  ;;  %v69_v9 = vld [vmem:[#allocation5 + $0x20] sm:$0xff]  ;;  %v71_v10 = vld [vmem:[#allocation5 + $0x30] sm:$0xff]  ;;  %s596_s12 = scalar_lea.vmem %s382_s11, 256  ;;  %p601_p11 = scmp.lt.s32.totalorder %s382_s11, %s382_s11 }
  0x3a   :  { %v399_v8 = vpack.c.bf16 %v72_v6, %v70_v5  ;;  %v74_v11 = vld [vmem:[#allocation5 + $0x48] sm:$0xff]  ;;  %396 = vmatprep.subr.bf16.mxu0 %v395_v3  ;;  %v76_v12 = vld [vmem:[#allocation5 + $0x58] sm:$0xff]  ;;  %v401_v13 = vpack.c.bf16 %v71_v10, %v69_v9  ;;  %v73_v15 = vld [vmem:[#allocation5 + $0x40] sm:$0xff]  ;;  %p597_p10 = scmp.ne.s32.totalorder %s382_s11, %s596_s12  ;;  %p602_p12 = scmp.lt.s32.totalorder %s596_s12, %s596_s12 }
  0x3b   :  { %398 = vmatpush1.bf16.msra.mxu0 %v397_v7  ;;  %v403_v14 = vpack.c.bf16 %v76_v12, %v74_v11  ;;  %v75_v16 = vld [vmem:[#allocation5 + $0x50] sm:$0xff]  ;;  %v78_v17 = vld [vmem:[#allocation5 + $0x68] sm:$0xff]  ;;  %v80_v18 = vld [vmem:[#allocation5 + $0x78] sm:$0xff] }
  0x3c   :  { %400 = vmatprep.subr.bf16.mxu0 %v399_v8  ;;  %v405_v19 = vpack.c.bf16 %v75_v16, %v73_v15  ;;  %v407_v20 = vpack.c.bf16 %v80_v18, %v78_v17  ;;  %v77_v21 = vld [vmem:[#allocation5 + $0x60] sm:$0xff]  ;;  %v79_v22 = vld [vmem:[#allocation5 + $0x70] sm:$0xff]  ;;  %v82_v23 = vld [vmem:[#allocation5 + $0x88] sm:$0xff]  ;;  %p603_p13 = por %p602_p12, %p601_p11 }
  0x3d   :  { %v84_v24 = vld [vmem:[#allocation5 + $0x98] sm:$0xff]  ;;  %v409_v25 = vpack.c.bf16 %v79_v22, %v77_v21  ;;  %v81_v27 = vld [vmem:[#allocation5 + $0x80] sm:$0xff]  ;;  %v83_v28 = vld [vmem:[#allocation5 + $0x90] sm:$0xff] }
  0x3e   :  { %v411_v26 = vpack.c.bf16 %v84_v24, %v82_v23  ;;  %v86_v29 = vld [vmem:[#allocation5 + $0xa8] sm:$0xff]  ;;  %v88_v30 = vld [vmem:[#allocation5 + $0xb8] sm:$0xff]  ;;  %v413_v31 = vpack.c.bf16 %v83_v28, %v81_v27  ;;  %v85_v33 = vld [vmem:[#allocation5 + $0xa0] sm:$0xff]  ;;  %p604_p0 = pnand %p603_p13, %p597_p10 }
  0x3f   :  { %402 = vmatpush1.bf16.msra.mxu0 %v401_v13  ;;  %v415_v32 = vpack.c.bf16 %v88_v30, %v86_v29  ;;  %v87_v34 = vld [vmem:[#allocation5 + $0xb0] sm:$0xff]  ;;  %v90_v35 = vld [vmem:[#allocation5 + $0xc8] sm:$0xff]  ;;  %v92_v36 = vld [vmem:[#allocation5 + $0xd8] sm:$0xff] }
  0x40   :  { %404 = vmatprep.subr.bf16.mxu0 %v403_v14  ;;  %v417_v37 = vpack.c.bf16 %v87_v34, %v85_v33  ;;  %v89_v38 = vld [vmem:[#allocation5 + $0xc0] sm:$0xff]  ;;  %v91_v39 = vld [vmem:[#allocation5 + $0xd0] sm:$0xff]  ;;  %v419_v40 = vpack.c.bf16 %v92_v36, %v90_v35  ;;  %v94_v41 = vld [vmem:[#allocation5 + $0xe8] sm:$0xff] }
  0x41   :  { %v96_v42 = vld [vmem:[#allocation5 + $0xf8] sm:$0xff]  ;;  %v217_v44 = vld [vmem:[#allocation7 + $0x8] sm:$0xff]  ;;  %v216_v46 = vld [vmem:[#allocation7] sm:$0xff]  ;;  %v421_v51 = vpack.c.bf16 %v91_v39, %v89_v38 }
  0x42   :  { %v64_v43 = vld [vmem:[#allocation2 + $0x8] sm:$0xff]  ;;  %v218_v48 = vld [vmem:[#allocation7 + $0x10] sm:$0xff]  ;;  %v221_v49 = vld [vmem:[#allocation7 + $0x28] sm:$0xff]  ;;  %v423_v57 = vpack.c.bf16 %v96_v42, %v94_v41 }
  0x43   :  { %406 = vmatpush1.bf16.msra.mxu0 %v405_v19  ;;  %205 = vmatprep.mubr.f32.mxu0 %v64_v43  ;;  %v219_v45 = vld [vmem:[#allocation7 + $0x18] sm:$0xff]  ;;  %v461_v52 = vpack.c.bf16 %v218_v48, %v216_v46  ;;  %v220_v54 = vld [vmem:[#allocation7 + $0x20] sm:$0xff]  ;;  %v222_v55 = vld [vmem:[#allocation7 + $0x30] sm:$0xff] }
  0x44   :  { %408 = vmatprep.subr.bf16.mxu0 %v407_v20  ;;  %v459_v47 = vpack.c.bf16 %v219_v45, %v217_v44  ;;  %v223_v50 = vld [vmem:[#allocation7 + $0x38] sm:$0xff]  ;;  %v225_v56 = vld [vmem:[#allocation7 + $0x48] sm:$0xff]  ;;  %v93_v58 = vld [vmem:[#allocation5 + $0xe0] sm:$0xff]  ;;  %v465_v63 = vpack.c.bf16 %v222_v55, %v220_v54 }
  0x45   :  { %v463_v53 = vpack.c.bf16 %v223_v50, %v221_v49  ;;  %v95_v59 = vld [vmem:[#allocation5 + $0xf0] sm:$0xff]  ;;  %v227_v60 = vld [vmem:[#allocation7 + $0x58] sm:$0xff]  ;;  %v98_v61 = vld [vmem:[#allocation5 + $0x108] sm:$0xff] }
  0x46   :  { %460 = vmatprep.subr.bf16.mxu1 %v459_v47  ;;  %v100_v62 = vld [vmem:[#allocation5 + $0x118] sm:$0xff]  ;;  %v467_v0 = vpack.c.bf16 %v227_v60, %v225_v56  ;;  %v224_v1 = vld [vmem:[#allocation7 + $0x40] sm:$0xff]  ;;  %v226_v2 = vld [vmem:[#allocation7 + $0x50] sm:$0xff]  ;;  %v425_v3 = vpack.c.bf16 %v95_v59, %v93_v58 }
  0x47   :  { %410 = vmatpush1.bf16.msra.mxu0 %v409_v25  ;;  %462 = vmatpush1.bf16.msra.mxu1 %v461_v52  ;;  %v229_v4 = vld [vmem:[#allocation7 + $0x68] sm:$0xff]  ;;  %v231_v5 = vld [vmem:[#allocation7 + $0x78] sm:$0xff]  ;;  %v427_v6 = vpack.c.bf16 %v100_v62, %v98_v61  ;;  %v97_v7 = vld [vmem:[#allocation5 + $0x100] sm:$0xff]  ;;  %v469_v11 = vpack.c.bf16 %v226_v2, %v224_v1 }
  0x48   :  { %412 = vmatprep.subr.bf16.mxu0 %v411_v26  ;;  %464 = vmatprep.subr.bf16.mxu1 %v463_v53  ;;  %v99_v8 = vld [vmem:[#allocation5 + $0x110] sm:$0xff]  ;;  %v102_v9 = vld [vmem:[#allocation5 + $0x128] sm:$0xff]  ;;  %v104_v10 = vld [vmem:[#allocation5 + $0x138] sm:$0xff]  ;;  %v471_v12 = vpack.c.bf16 %v231_v5, %v229_v4 }
  0x49   :  { %v228_v13 = vld [vmem:[#allocation7 + $0x60] sm:$0xff]  ;;  %v230_v14 = vld [vmem:[#allocation7 + $0x70] sm:$0xff]  ;;  %v429_v15 = vpack.c.bf16 %v99_v8, %v97_v7  ;;  %v233_v16 = vld [vmem:[#allocation7 + $0x88] sm:$0xff]  ;;  %v431_v18 = vpack.c.bf16 %v104_v10, %v102_v9 }
  0x4a   :  { %v235_v17 = vld [vmem:[#allocation7 + $0x98] sm:$0xff]  ;;  %v101_v19 = vld [vmem:[#allocation5 + $0x120] sm:$0xff]  ;;  %v103_v20 = vld [vmem:[#allocation5 + $0x130] sm:$0xff]  ;;  %v473_v23 = vpack.c.bf16 %v230_v14, %v228_v13 }
  0x4b   :  { %414 = vmatpush1.bf16.msra.mxu0 %v413_v31  ;;  %466 = vmatpush1.bf16.msra.mxu1 %v465_v63  ;;  %v106_v21 = vld [vmem:[#allocation5 + $0x148] sm:$0xff]  ;;  %v108_v22 = vld [vmem:[#allocation5 + $0x158] sm:$0xff]  ;;  %v475_v24 = vpack.c.bf16 %v235_v17, %v233_v16  ;;  %v232_v25 = vld [vmem:[#allocation7 + $0x80] sm:$0xff]  ;;  %v433_v27 = vpack.c.bf16 %v103_v20, %v101_v19 }
  0x4c   :  { %416 = vmatprep.subr.bf16.mxu0 %v415_v32  ;;  %468 = vmatprep.subr.bf16.mxu1 %v467_v0  ;;  %v234_v26 = vld [vmem:[#allocation7 + $0x90] sm:$0xff]  ;;  %v237_v28 = vld [vmem:[#allocation7 + $0xa8] sm:$0xff]  ;;  %v239_v29 = vld [vmem:[#allocation7 + $0xb8] sm:$0xff]  ;;  %v435_v30 = vpack.c.bf16 %v108_v22, %v106_v21 }
  0x4d   :  { %v105_v31 = vld [vmem:[#allocation5 + $0x140] sm:$0xff]  ;;  %v107_v32 = vld [vmem:[#allocation5 + $0x150] sm:$0xff]  ;;  %v110_v33 = vld [vmem:[#allocation5 + $0x168] sm:$0xff]  ;;  %v477_v35 = vpack.c.bf16 %v234_v26, %v232_v25  ;;  %v479_v36 = vpack.c.bf16 %v239_v29, %v237_v28 }
  0x4e   :  { %v112_v34 = vld [vmem:[#allocation5 + $0x178] sm:$0xff]  ;;  %v238_v38 = vld [vmem:[#allocation7 + $0xb0] sm:$0xff]  ;;  %v437_v39 = vpack.c.bf16 %v107_v32, %v105_v31  ;;  %v109_v43 = vld [vmem:[#allocation5 + $0x160] sm:$0xff] }
  0x4f   :  { %418 = vmatpush1.bf16.msra.mxu0 %v417_v37  ;;  %470 = vmatpush1.bf16.msra.mxu1 %v469_v11  ;;  %v236_v37 = vld [vmem:[#allocation7 + $0xa0] sm:$0xff]  ;;  %v243_v41 = vld [vmem:[#allocation7 + $0xd8] sm:$0xff]  ;;  %v439_v42 = vpack.c.bf16 %v112_v34, %v110_v33  ;;  %v111_v44 = vld [vmem:[#allocation5 + $0x170] sm:$0xff] }
  0x50   :  { %420 = vmatprep.subr.bf16.mxu0 %v419_v40  ;;  %472 = vmatprep.subr.bf16.mxu1 %v471_v12  ;;  %v241_v40 = vld [vmem:[#allocation7 + $0xc8] sm:$0xff]  ;;  %v116_v46 = vld [vmem:[#allocation5 + $0x198] sm:$0xff]  ;;  %v481_v47 = vpack.c.bf16 %v238_v38, %v236_v37  ;;  %v240_v49 = vld [vmem:[#allocation7 + $0xc0] sm:$0xff] }
  0x51   :  { %v114_v45 = vld [vmem:[#allocation5 + $0x188] sm:$0xff]  ;;  %v483_v48 = vpack.c.bf16 %v243_v41, %v241_v40  ;;  %v242_v50 = vld [vmem:[#allocation7 + $0xd0] sm:$0xff]  ;;  %v247_v53 = vld [vmem:[#allocation7 + $0xf8] sm:$0xff] }
  0x52   :  { %v245_v52 = vld [vmem:[#allocation7 + $0xe8] sm:$0xff]  ;;  %v443_v54 = vpack.c.bf16 %v116_v46, %v114_v45  ;;  %v113_v55 = vld [vmem:[#allocation5 + $0x180] sm:$0xff]  ;;  %v115_v56 = vld [vmem:[#allocation5 + $0x190] sm:$0xff]  ;;  %v485_v59 = vpack.c.bf16 %v242_v50, %v240_v49 }
  0x53   :  { %422 = vmatpush1.bf16.msra.mxu0 %v421_v51  ;;  %474 = vmatpush1.bf16.msra.mxu1 %v473_v23  ;;  %v441_v51 = vpack.c.bf16 %v111_v44, %v109_v43  ;;  %v120_v58 = vld [vmem:[#allocation5 + $0x1b8] sm:$0xff]  ;;  %v487_v60 = vpack.c.bf16 %v247_v53, %v245_v52  ;;  %v244_v61 = vld [vmem:[#allocation7 + $0xe0] sm:$0xff]  ;;  %v246_v62 = vld [vmem:[#allocation7 + $0xf0] sm:$0xff]  ;;  %v445_v63 = vpack.c.bf16 %v115_v56, %v113_v55 }
  0x54   :  { %424 = vmatprep.subr.bf16.mxu0 %v423_v57  ;;  %476 = vmatprep.subr.bf16.mxu1 %v475_v24  ;;  %v118_v57 = vld [vmem:[#allocation5 + $0x1a8] sm:$0xff]  ;;  %v251_v1 = vld [vmem:[#allocation7 + $0x118] sm:$0xff]  ;;  %v119_v4 = vld [vmem:[#allocation5 + $0x1b0] sm:$0xff]  ;;  %v489_v7 = vpack.c.bf16 %v246_v62, %v244_v61 }
  0x55   :  { %v249_v0 = vld [vmem:[#allocation7 + $0x108] sm:$0xff]  ;;  %v447_v2 = vpack.c.bf16 %v120_v58, %v118_v57  ;;  %v248_v9 = vld [vmem:[#allocation7 + $0x100] sm:$0xff]  ;;  %v250_v10 = vld [vmem:[#allocation7 + $0x110] sm:$0xff] }
  0x56   :  { %v122_v5 = vld [vmem:[#allocation5 + $0x1c8] sm:$0xff]  ;;  %v491_v8 = vpack.c.bf16 %v251_v1, %v249_v0  ;;  %v255_v13 = vld [vmem:[#allocation7 + $0x138] sm:$0xff]  ;;  %v123_v16 = vld [vmem:[#allocation5 + $0x1d0] sm:$0xff]  ;;  %v493_v19 = vpack.c.bf16 %v250_v10, %v248_v9 }
  0x57   :  { %426 = vmatpush1.bf16.msra.mxu0 %v425_v3  ;;  %478 = vmatpush1.bf16.msra.mxu1 %v477_v35  ;;  %v117_v3 = vld [vmem:[#allocation5 + $0x1a0] sm:$0xff]  ;;  %v253_v12 = vld [vmem:[#allocation7 + $0x128] sm:$0xff]  ;;  %v254_v22 = vld [vmem:[#allocation7 + $0x130] sm:$0xff] }
  0x58   :  { %428 = vmatprep.subr.bf16.mxu0 %v427_v6  ;;  %480 = vmatprep.subr.bf16.mxu1 %v479_v36  ;;  %v124_v6 = vld [vmem:[#allocation5 + $0x1d8] sm:$0xff]  ;;  %v449_v11 = vpack.c.bf16 %v119_v4, %v117_v3  ;;  %v126_v17 = vld [vmem:[#allocation5 + $0x1e8] sm:$0xff]  ;;  %v495_v20 = vpack.c.bf16 %v255_v13, %v253_v12  ;;  %v252_v21 = vld [vmem:[#allocation7 + $0x120] sm:$0xff] }
  0x59   :  { %v451_v14 = vpack.c.bf16 %v124_v6, %v122_v5  ;;  %v257_v24 = vld [vmem:[#allocation7 + $0x148] sm:$0xff]  ;;  %v259_v25 = vld [vmem:[#allocation7 + $0x158] sm:$0xff]  ;;  %v127_v28 = vld [vmem:[#allocation5 + $0x1f0] sm:$0xff]  ;;  %v497_v29 = vpack.c.bf16 %v254_v22, %v252_v21 }
  0x5a   :  { %v256_v31 = vld [vmem:[#allocation7 + $0x140] sm:$0xff]  ;;  %v258_v32 = vld [vmem:[#allocation7 + $0x150] sm:$0xff]  ;;  %v261_v34 = vld [vmem:[#allocation7 + $0x168] sm:$0xff] }
  0x5b   :  { %430 = vmatpush1.bf16.msra.mxu0 %v429_v15  ;;  %482 = vmatpush1.bf16.msra.mxu1 %v481_v47  ;;  %v121_v15 = vld [vmem:[#allocation5 + $0x1c0] sm:$0xff]  ;;  %v263_v35 = vld [vmem:[#allocation7 + $0x178] sm:$0xff]  ;;  %v501_v36 = vpack.c.bf16 %v258_v32, %v256_v31  ;;  %v63_v40 = vld [vmem:[#allocation2] sm:$0xff] }
  0x5c   :  { %432 = vmatprep.subr.bf16.mxu0 %v431_v18  ;;  %484 = vmatprep.subr.bf16.mxu1 %v483_v48  ;;  %v128_v18 = vld [vmem:[#allocation5 + $0x1f8] sm:$0xff]  ;;  %v453_v23 = vpack.c.bf16 %v123_v16, %v121_v15  ;;  %v503_v37 = vpack.c.bf16 %v263_v35, %v261_v34  ;;  %v260_v38 = vld [vmem:[#allocation7 + $0x160] sm:$0xff]  ;;  %v265_v41 = vld [vmem:[#allocation7 + $0x188] sm:$0xff] }
  0x5d   :  { %v455_v26 = vpack.c.bf16 %v128_v18, %v126_v17  ;;  %v264_v45 = vld [vmem:[#allocation7 + $0x180] sm:$0xff]  ;;  %v266_v46 = vld [vmem:[#allocation7 + $0x190] sm:$0xff]  ;;  %v269_v47 = vld [vmem:[#allocation7 + $0x1a8] sm:$0xff] }
  0x5e   :  { %v271_v48 = vld [vmem:[#allocation7 + $0x1b8] sm:$0xff]  ;;  %v509_v49 = vpack.c.bf16 %v266_v46, %v264_v45  ;;  %v270_v52 = vld [vmem:[#allocation7 + $0x1b0] sm:$0xff]  ;;  %v273_v53 = vld [vmem:[#allocation7 + $0x1c8] sm:$0xff] }
  0x5f   :  { %434 = vmatpush1.bf16.msra.mxu0 %v433_v27  ;;  %486 = vmatpush1.bf16.msra.mxu1 %v485_v59  ;;  %v125_v27 = vld [vmem:[#allocation5 + $0x1e0] sm:$0xff]  ;;  %v511_v50 = vpack.c.bf16 %v271_v48, %v269_v47  ;;  %v274_v58 = vld [vmem:[#allocation7 + $0x1d0] sm:$0xff]  ;;  %v279_v61 = vld [vmem:[#allocation7 + $0x1f8] sm:$0xff] }
  0x60   :  { %436 = vmatprep.subr.bf16.mxu0 %v435_v30  ;;  %488 = vmatprep.subr.bf16.mxu1 %v487_v60  ;;  %v499_v30 = vpack.c.bf16 %v259_v25, %v257_v24  ;;  %v457_v33 = vpack.c.bf16 %v127_v28, %v125_v27  ;;  %v272_v57 = vld [vmem:[#allocation7 + $0x1c0] sm:$0xff]  ;;  %v277_v60 = vld [vmem:[#allocation7 + $0x1e8] sm:$0xff]  ;;  %v278_v0 = vld [vmem:[#allocation7 + $0x1f0] sm:$0xff] }
  0x61   :  { %v517_v59 = vpack.c.bf16 %v274_v58, %v272_v57  ;;  %v519_v62 = vpack.c.bf16 %v279_v61, %v277_v60  ;;  %v129_v5 = vld [vmem:[%s764_s2] sm:$0x3] }
  0x63   :  { %438 = vmatpush1.bf16.msra.mxu0 %v437_v39  ;;  %490 = vmatpush1.bf16.msra.mxu1 %v489_v7  ;;  %v262_v39 = vld [vmem:[#allocation7 + $0x170] sm:$0xff] }
  0x64   :  { %440 = vmatprep.subr.bf16.mxu0 %v439_v42  ;;  %492 = vmatprep.subr.bf16.mxu1 %v491_v8  ;;  %v267_v42 = vld [vmem:[#allocation7 + $0x198] sm:$0xff]  ;;  %v505_v43 = vpack.c.bf16 %v262_v39, %v260_v38 }
  0x65   :  { %v507_v44 = vpack.c.bf16 %v267_v42, %v265_v41 }
  0x67   :  { %442 = vmatpush1.bf16.msra.mxu0 %v441_v51  ;;  %494 = vmatpush1.bf16.msra.mxu1 %v493_v19  ;;  %v268_v51 = vld [vmem:[#allocation7 + $0x1a0] sm:$0xff] }
  0x68   :  { %444 = vmatprep.subr.bf16.mxu0 %v443_v54  ;;  %496 = vmatprep.subr.bf16.mxu1 %v495_v20  ;;  %v275_v54 = vld [vmem:[#allocation7 + $0x1d8] sm:$0xff]  ;;  %v513_v55 = vpack.c.bf16 %v270_v52, %v268_v51 }
  0x69   :  { %v515_v56 = vpack.c.bf16 %v275_v54, %v273_v53 }
  0x6b   :  { %446 = vmatpush1.bf16.msra.mxu0 %v445_v63  ;;  %498 = vmatpush1.bf16.msra.mxu1 %v497_v29  ;;  %v276_v63 = vld [vmem:[#allocation7 + $0x1e0] sm:$0xff] }
  0x6c   :  { %448 = vmatprep.subr.bf16.mxu0 %v447_v2  ;;  %500 = vmatprep.subr.bf16.mxu1 %v499_v30  ;;  %v521_v1 = vpack.c.bf16 %v278_v0, %v276_v63  ;;  %v131_v2 = vlaneseq }
  0x6e   :  { %v132_v3 = vshrl.u32 %v131_v2, 7 }
  0x6f   :  { %450 = vmatpush1.bf16.msra.mxu0 %v449_v11  ;;  %502 = vmatpush1.bf16.msra.mxu1 %v501_v36 }
  0x70   :  { %452 = vmatprep.subr.bf16.mxu0 %v451_v14  ;;  %504 = vmatprep.subr.bf16.mxu1 %v503_v37  ;;  %v133_v4 = vsub.s32 0, %v132_v3  ;;  %v137_v6 = vsub.s32 1, %v132_v3 }
  0x72   :  { %v134_v7 = vrot.slane %v129_v5, %v133_v4  ;;  %v138_v8 = vrot.slane %v129_v5, %v137_v6 }
  0x73   :  { %454 = vmatpush1.bf16.msra.mxu0 %v453_v23  ;;  %506 = vmatpush1.bf16.msra.mxu1 %v505_v43 }
  0x74   :  { %456 = vmatprep.subr.bf16.mxu0 %v455_v26  ;;  %508 = vmatprep.subr.bf16.mxu1 %v507_v44 }
  0x77   :  { %458 = vmatpush1.bf16.msra.mxu0 %v457_v33  ;;  %510 = vmatpush1.bf16.msra.mxu1 %v509_v49 }
  0x78   :  { %512 = vmatprep.subr.bf16.mxu1 %v511_v50 }
  0x7a   :  { %206 = vmatmul.mubr.f32.vlgmr.msra.gmra.mrb[0].mxu0 %v63_v40 }
  0x7b   :  { %514 = vmatpush1.bf16.msra.mxu1 %v513_v55 }
  0x7c   :  { %516 = vmatprep.subr.bf16.mxu1 %v515_v56 }
  0x7f   :  { %518 = vmatpush1.bf16.msra.mxu1 %v517_v59 }
  0x80   :  { %520 = vmatprep.subr.bf16.mxu1 %v519_v62 }
  0x83   :  { %522 = vmatpush1.bf16.msra.mxu1 %v521_v1 }
 0x14d   :  { %v207_v9 = vpop.f32.mrb[0].mxu0 }
 0x14e   :  { %v208_v10 = vadd.f32 %v207_v9, %v134_v7  ;;  %v209_v11 = vpop.f32.mrb[1].mxu0 }
 0x14f   :  { %v210_v12 = vadd.f32 %v209_v11, %v138_v8 }
 0x150   :  { %v212_v13 = vmax.f32 %v208_v10, 0.0 }
 0x151   :  { %v213_v14 = vmax.f32 %v210_v12, 0.0 }
 0x152   :  { %214 = vst [vmem:[#allocation9] sm:$0xff] %v212_v13 }
 0x153   :  { %215 = vst [vmem:[#allocation9 + $0x8] sm:$0xff] %v213_v14  ;;  %356 = vmatprep.mubr.f32.mxu1 %v213_v14 }
 0x154   :  { %357 = vmatmul.mubr.f32.vlgmr.msra.gmra.mrb[0].mxu1 %v212_v13 }
 0x155   :  { %607 = shalt.err (!%p604_p0)
}
 0x156   :  { %s608_s14 = scalar_lea.hbm %s768_s6, 256 }
 0x157   :  { %p609_p1 = scmp.ne.s32.totalorder %s768_s6, %s608_s14  ;;  %p612_p2 = scmp.lt.u32.totalorder %s608_s14, %s768_s6 }
 0x159   :  { %p614_p3 = pnand %p612_p2, %p609_p1 }
 0x15b   :  { %617 = shalt.err (!%p614_p3)
}
 0x15c   :  { %384 = dma.vmem_to_hbm [thread:$0]  %s382_s11, 256, %s768_s6, [#allocation10]   ;;  %v280_v15 = vld [vmem:[%s766_s4] sm:$0x3] }
 0x15d   :  { %v285_v16 = vrot.slane %v280_v15, %v133_v4  ;;  %v289_v17 = vrot.slane %v280_v15, %v137_v6  ;;  %s654_s22 = smov [#allocation8]  }
 0x15e   :  { %s371_s23 = sshll.u32 %s654_s22, 4  ;;  %s372_s23 = int_to_ptr.vmem [resolvable:$true] %s371_s23 }
 0x15f   :  { %s618_s24 = scalar_lea.vmem %s372_s23, 256  ;;  %p623_p5 = scmp.lt.s32.totalorder %s372_s23, %s372_s23 }
 0x160   :  { %p619_p4 = scmp.ne.s32.totalorder %s372_s23, %s618_s24  ;;  %p624_p6 = scmp.lt.s32.totalorder %s618_s24, %s618_s24 }
 0x162   :  { %p625_p7 = por %p624_p6, %p623_p5 }
 0x164   :  { %p626_p8 = pnand %p625_p7, %p619_p4 }
 0x227   :  { %v358_v18 = vpop.f32.mrb[0].mxu1 }
 0x228   :  { %v359_v19 = vadd.f32 %v358_v18, %v285_v16  ;;  %v360_v20 = vpop.f32.mrb[1].mxu1 }
 0x229   :  { %v361_v21 = vadd.f32 %v360_v20, %v289_v17 }
 0x22a   :  { %363 = vst [vmem:[#allocation8] sm:$0xff] %v359_v19 }
 0x22b   :  { %364 = vst [vmem:[#allocation8 + $0x8] sm:$0xff] %v361_v21 }
 0x22c   :  { %629 = shalt.err (!%p626_p8)
}
 0x22d   :  { %s630_s25 = scalar_lea.hbm %s767_s5, 256 }
 0x22e   :  { %p631_p9 = scmp.ne.s32.totalorder %s767_s5, %s630_s25  ;;  %p634_p10 = scmp.lt.u32.totalorder %s630_s25, %s767_s5 }
 0x230   :  { %p636_p11 = pnand %p634_p10, %p631_p9 }
 0x232   :  { %639 = shalt.err (!%p636_p11)
}
 0x233   :  { %374 = dma.vmem_to_hbm [thread:$0]  %s372_s23, 256, %s767_s5, [#allocation4]  }
 0x234   :  { %644 = dma.done.wait [#allocation4], 256  }
 0x235   :  { %645 = vsyncadd [#allocation4], 4294967040 }
 0x236   :  { %646 = dma.done.wait [#allocation10], 256  }
 0x237   :  { %647 = vsyncadd [#allocation10], 4294967040 }
 0x238   :  { %391 = vsyncpa [#allocation3], 1 }
 0x239   :  { %392 = vsyncpa [#allocation6], 1 }
 0x23a   :  { %393 = vsyncpa [#allocation4], 1 }
 0x23b   :  { %394 = vsyncpa [#allocation10], 1 }

</bundles_post_ra>
